<compile_context>
chip_gen: v6e
topology: v6e:2x2x1
jax: 0.10.0
libtpu: 0.0.40
codegen_flags: <defaults>
</compile_context>

<pallas_src>
import functools

import jax
import jax.numpy as jnp
from jax.experimental import pallas as pl
from jax.experimental.pallas import tpu as pltpu

GAMMA = 2.0  # module defaults: gamma=2, alpha=None, reduction='mean'


def _focal_partial_kernel(x_ref, ft_ref, out_ref, *, c_packed, pf, tn, valid_last):
    """Per-block partial sums of the gathered log-probs.

    x_ref  : (TN, C_packed) log-probs (lane-dense when packed)
    ft_ref : (TN, PF) int32 flat lane index of each sub-row's target
    out_ref: (1, 8, C_packed) f32 partial sums (vreg-shaped, dense store)
    """
    i = pl.program_id(0)

    def compute(apply_row_mask):
        x = x_ref[...].astype(jnp.float32)
        col = jax.lax.broadcasted_iota(jnp.int32, (tn, c_packed), 1)
        # One-hot "gather": lane == (sub_row * C + target), precomputed per row.
        mask = col == ft_ref[:, 0:1]
        for j in range(1, pf):
            mask = mask | (col == ft_ref[:, j:j + 1])
        if apply_row_mask:
            # Only the ragged last block pays for this extra iota/compare/and.
            row = jax.lax.broadcasted_iota(jnp.int32, (tn, c_packed), 0)
            mask = mask & (row < valid_last)
        # Select (not multiply): stale/OOB VMEM rows must not leak NaN/Inf.
        picked = jnp.where(mask, x, jnp.zeros_like(x))
        # Reduce only across 8-row groups: pure vreg adds, no cross-lane XLU.
        out_ref[0] = picked.reshape(tn // 8, 8, c_packed).sum(axis=0)

    if valid_last == tn:          # no ragged block at all
        compute(False)
    else:
        last = pl.num_programs(0) - 1

        @pl.when(i != last)
        def _steady():
            compute(False)

        @pl.when(i == last)
        def _ragged():
            compute(True)


def _vmem_budget_bytes():
    """Returns (buffer budget, vmem_limit) — conservative on 64 MiB parts (v7x)."""
    try:
        cap = pltpu.get_tpu_info().vmem_capacity_bytes
    except Exception:
        cap = 64 * 1024 * 1024
    if cap >= 128 * 1024 * 1024:                      # v5e / v6e
        return 72 * 1024 * 1024, 100 * 1024 * 1024
    return 26 * 1024 * 1024, 48 * 1024 * 1024         # v7x: 64 MiB physical


def focal_loss(inp, target, gamma=GAMMA, alpha=None, reduction="mean",
               max_rows_per_block=None):
    """inp: (N, C) float log-probabilities, target: (N,) int class indices."""
    # TODO(synk): alpha (per-class weight) path of FocalLoss not implemented
    # (module default alpha=None).
    del alpha
    # reduction 'mean'/'sum'/'none' of a 0-d loss are the same scalar.
    del reduction

    n, c = inp.shape
    target = target.astype(jnp.int32)

    # ---- lane-dense repack: (N, C) -> (N/PF, PF*C) when 128 % C == 0 --------
    pf = (128 // c) if (c < 128 and 128 % c == 0) else 1
    rows_unit = 8 * pf                       # original rows per 8 packed rows
    n_main = (n // rows_unit) * rows_unit

    tail_sum = jnp.float32(0.0)
    if n_main == 0:
        # Whole batch smaller than one sublane group: pad (tiny, <= 8*PF rows).
        pad = rows_unit - n
        inp_main = jnp.pad(inp, ((0, pad), (0, 0)))   # zero rows contribute 0
        tgt_main = jnp.pad(target, ((0, pad),))
        n_main = rows_unit
    else:
        inp_main = inp[:n_main]
        tgt_main = target[:n_main]
        if n_main < n:
            # Ragged tail (< 8*PF rows): gather in plain JAX, fold into the mean.
            t_tail = target[n_main:]
            tail_sum = jnp.sum(jnp.take_along_axis(
                inp[n_main:].astype(jnp.float32), t_tail[:, None], axis=1))

    n_packed = n_main // pf                  # multiple of 8 by construction
    c_packed = pf * c
    x_packed = inp_main.reshape(n_packed, c_packed)       # free row-major view
    # Flat lane index of each row's target inside its packed row.
    ft = (jnp.arange(n_main, dtype=jnp.int32) % pf) * c + tgt_main
    ft_packed = ft.reshape(n_packed, pf)

    # ---- row tile sized by bytes (double-buffered input + lane-padded tgt) --
    buf_budget, vmem_limit = _vmem_budget_bytes()
    lane_pad = lambda k: ((k + 127) // 128) * 128
    per_row_bytes = 2 * 4 * (lane_pad(c_packed) + lane_pad(pf))   # 2 = dbl buffer
    tn = max(8, (buf_budget // per_row_bytes) // 8 * 8)
    if max_rows_per_block is not None:
        tn = min(tn, max(8, (max_rows_per_block // 8) * 8))
    tn = min(tn, n_packed)
    n_blocks = -(-n_packed // tn)
    valid_last = n_packed - (n_blocks - 1) * tn

    partials = pl.pallas_call(
        functools.partial(_focal_partial_kernel, c_packed=c_packed, pf=pf,
                          tn=tn, valid_last=valid_last),
        out_shape=jax.ShapeDtypeStruct((n_blocks, 8, c_packed), jnp.float32),
        grid=(n_blocks,),
        in_specs=[
            pl.BlockSpec((tn, c_packed), lambda i: (i, 0)),
            pl.BlockSpec((tn, pf), lambda i: (i, 0)),
        ],
        out_specs=pl.BlockSpec((1, 8, c_packed), lambda i: (i, 0, 0)),
        compiler_params=pltpu.CompilerParams(
            dimension_semantics=("parallel",),   # independent per-block partials
            vmem_limit_bytes=vmem_limit,
        ),
        cost_estimate=pl.CostEstimate(
            flops=int(5 * n_packed * c_packed),
            transcendentals=0,
            bytes_accessed=int(n_packed * c_packed * 4 + n_packed * pf * 4
                               + n_blocks * 8 * c_packed * 4),
        ),
    )(x_packed, ft_packed)

    # ---- tiny scalar finalize in plain JAX (matches the PyTorch module) -----
    total = jnp.sum(partials, dtype=jnp.float32) + tail_sum
    ce = -total / jnp.float32(n)             # F.nll_loss(..., reduction='mean')
    pt = jnp.exp(-ce)
    omp = 1.0 - pt
    if gamma == 2.0:
        focal = omp * omp * ce               # exact square, no pow
    else:
        focal = omp ** jnp.float32(gamma) * ce
    return focal


def focal_loss_ref(inp, target, gamma=GAMMA):
    # Pure-JAX reference mirroring the PyTorch module (gamma=2, alpha=None,
    # reduction='mean').
    logp_true = jnp.take_along_axis(
        inp.astype(jnp.float32), target[:, None].astype(jnp.int32), axis=1)[:, 0]
    ce = -jnp.mean(logp_true)
    pt = jnp.exp(-ce)
    return (1.0 - pt) ** gamma * ce


if __name__ == "__main__":
    key = jax.random.PRNGKey(0)
    ks = jax.random.split(key, 6)

    # Case 1: tiny batch (module-typical small shapes) -> lane-packed, single block.
    N1, C1 = 8, 32
    lp1 = jax.nn.log_softmax(
        jax.random.normal(ks[0], (N1, C1), dtype=jnp.float32), axis=-1)
    t1 = jax.random.randint(ks[1], (N1,), 0, C1, dtype=jnp.int32)
    out1 = jax.block_until_ready(focal_loss(lp1, t1))
    ref1 = focal_loss_ref(lp1, t1)
    assert jnp.allclose(out1, ref1, rtol=1e-5, atol=1e-6), (out1, ref1)

    # Case 2: multi-block parallel grid + ragged last block + JAX tail
    # (max_rows_per_block forces >1 grid step at small N).
    N2, C2 = 1234, 32
    lp2 = jax.nn.log_softmax(
        jax.random.normal(ks[2], (N2, C2), dtype=jnp.float32), axis=-1)
    t2 = jax.random.randint(ks[3], (N2,), 0, C2, dtype=jnp.int32)
    out2 = jax.block_until_ready(focal_loss(lp2, t2, max_rows_per_block=128))
    ref2 = focal_loss_ref(lp2, t2)
    assert jnp.allclose(out2, ref2, rtol=1e-4, atol=1e-5), (out2, ref2)

    # Case 3: C not a divisor of 128 -> un-packed fallback path (PF=1).
    N3, C3 = 100, 200
    lp3 = jax.nn.log_softmax(
        jax.random.normal(ks[4], (N3, C3), dtype=jnp.float32), axis=-1)
    t3 = jax.random.randint(ks[5], (N3,), 0, C3, dtype=jnp.int32)
    out3 = jax.block_until_ready(focal_loss(lp3, t3))
    ref3 = focal_loss_ref(lp3, t3)
    assert jnp.allclose(out3, ref3, rtol=1e-4, atol=1e-5), (out3, ref3)

    print("KERNEL_OK")
</pallas_src>

<mosaic_0001>
module attributes {stable_mosaic.version = 11 : i64} {
  func.func @_focal_partial_kernel(%arg0: i32, %arg1: memref<8x128xf32, #tpu.memory_space<vmem>>, %arg2: memref<8x4xi32, #tpu.memory_space<vmem>>, %arg3: memref<1x8x128xf32, #tpu.memory_space<vmem>>) attributes {dimension_semantics = [#tpu.dimension_semantics<parallel>], iteration_bounds = array<i64: 1>, scalar_prefetch = 0 : i64, scratch_operands = 0 : i64, tpu.core_type = #tpu.core_type<tc>, window_params = [{transform_indices = @transform_0, window_bounds = array<i64: 8, 128>}, {transform_indices = @transform_1, window_bounds = array<i64: 8, 4>}, {transform_indices = @transform_2, window_bounds = array<i64: 1, 8, 128>}]} {
    %c0 = arith.constant 0 : index
    %c0_0 = arith.constant 0 : index
    %0 = vector.load %arg1[%c0, %c0_0] : memref<8x128xf32, #tpu.memory_space<vmem>>, vector<8x128xf32>
    %1 = tpu.iota {dimensions = array<i32: 1>} : vector<8x128xi32>
    %c0_1 = arith.constant 0 : index
    %c0_2 = arith.constant 0 : index
    %2 = vector.load %arg2[%c0_1, %c0_2] : memref<8x4xi32, #tpu.memory_space<vmem>>, vector<8x1xi32>
    %3 = vector.broadcast %2 : vector<8x1xi32> to vector<8x128xi32>
    %4 = arith.cmpi eq, %1, %3 : vector<8x128xi32>
    %c0_3 = arith.constant 0 : index
    %c1 = arith.constant 1 : index
    %5 = vector.load %arg2[%c0_3, %c1] : memref<8x4xi32, #tpu.memory_space<vmem>>, vector<8x1xi32>
    %6 = vector.broadcast %5 : vector<8x1xi32> to vector<8x128xi32>
    %7 = arith.cmpi eq, %1, %6 : vector<8x128xi32>
    %8 = arith.ori %4, %7 : vector<8x128xi1>
    %c0_4 = arith.constant 0 : index
    %c2 = arith.constant 2 : index
    %9 = vector.load %arg2[%c0_4, %c2] : memref<8x4xi32, #tpu.memory_space<vmem>>, vector<8x1xi32>
    %10 = vector.broadcast %9 : vector<8x1xi32> to vector<8x128xi32>
    %11 = arith.cmpi eq, %1, %10 : vector<8x128xi32>
    %12 = arith.ori %8, %11 : vector<8x128xi1>
    %c0_5 = arith.constant 0 : index
    %c3 = arith.constant 3 : index
    %13 = vector.load %arg2[%c0_5, %c3] : memref<8x4xi32, #tpu.memory_space<vmem>>, vector<8x1xi32>
    %14 = vector.broadcast %13 : vector<8x1xi32> to vector<8x128xi32>
    %15 = arith.cmpi eq, %1, %14 : vector<8x128xi32>
    %16 = arith.ori %12, %15 : vector<8x128xi1>
    %cst = arith.constant 0.000000e+00 : f32
    %17 = vector.broadcast %cst : f32 to vector<8x128xf32>
    %18 = arith.select %16, %0, %17 : vector<8x128xi1>, vector<8x128xf32>
    %19 = vector.shape_cast %18 : vector<8x128xf32> to vector<1x8x128xf32>
    %cst_6 = arith.constant dense<0.000000e+00> : vector<8x128xf32>
    %20 = vector.multi_reduction <add>, %19, %cst_6 [0] : vector<1x8x128xf32> to vector<8x128xf32>
    %c0_7 = arith.constant 0 : index
    %c0_8 = arith.constant 0 : index
    %c0_9 = arith.constant 0 : index
    %21 = vector.load %arg3[%c0_7, %c0_8, %c0_9] : memref<1x8x128xf32, #tpu.memory_space<vmem>>, vector<1x8x128xf32>
    %22 = vector.shape_cast %21 : vector<1x8x128xf32> to vector<8x128xf32>
    %23 = vector.shape_cast %20 : vector<8x128xf32> to vector<1x8x128xf32>
    tpu.vector_store %arg3[%c0_7, %c0_8, %c0_9], %23 {strides = array<i32>} : memref<1x8x128xf32, #tpu.memory_space<vmem>>, vector<1x8x128xf32>,
    return
  }
  func.func @transform_0(%arg0: i32) -> (i32, i32) {
    %c0_i32 = arith.constant 0 : i32
    %c0_i32_0 = arith.constant 0 : i32
    return %arg0, %c0_i32 : i32, i32
  }
  func.func @transform_1(%arg0: i32) -> (i32, i32) {
    %c0_i32 = arith.constant 0 : i32
    %c0_i32_0 = arith.constant 0 : i32
    return %arg0, %c0_i32 : i32, i32
  }
  func.func @transform_2(%arg0: i32) -> (i32, i32, i32) {
    %c0_i32 = arith.constant 0 : i32
    %c0_i32_0 = arith.constant 0 : i32
    %c0_i32_1 = arith.constant 0 : i32
    return %arg0, %c0_i32, %c0_i32_0 : i32, i32, i32
  }
}

</mosaic_0001>

<bundles_post_ra>
// kernel: tpu_custom_call.1
= control target key start
LH: loop header
LB: loop body
LE: loop exit
PB: predicated region body
PF: predicated region fallthrough
CT: control target
= control target key end

     0   :  { %v84_v1 = vmov 0   ;;  %v85_v2 = vmov 2   ;;  %s113_s0 = inlined_call_operand.vmem [shape: f32[8,128], index: 0, kind: input, shape index: {}]   ;;  %s114_s1 = inlined_call_operand.vmem [shape: s32[8,4], index: 1, kind: input, shape index: {}]   ;;  %s115_s2 = inlined_call_operand.hbm [shape: f32[1,8,128], index: 2, kind: output, shape index: {}]  }
   0x1   :  { %v15_v0 = vld [vmem:[%s114_s1] sm:$0xff]  ;;  %57 = vset.pattern.permute.xlu0 %v84_v1  ;;  %59 = vset.pattern.permute.xlu1 %v85_v2 }
   0x2   :  { %7 = vsyncpa [#allocation3], 0  ;;  %17 = vperm.xlu0 %57, %v15_v0   ;;  %26 = vperm.xlu1 %59, %v15_v0   ;;  %v86_v3 = vmov 1   ;;  %v87_v4 = vmov 3   ;;  %v13_v5 = vlaneseq  ;;  %s88_s1 = smov [#allocation2]   ;;  %v12_v11 = vld [vmem:[%s113_s0] sm:$0xff] }
   0x3   :  { %s44_s11 = sshll.u32 %s88_s1, 4  ;;  %s45_s11 = int_to_ptr.vmem [resolvable:$true] %s44_s11 }
   0x4   :  { %v14_v8 = vand.u32 127, %v13_v5  ;;  %s62_s14 = scalar_lea.vmem %s45_s11, 128  ;;  %p67_p1 = scmp.lt.s32.totalorder %s45_s11, %s45_s11 }
   0x5   :  { %p63_p0 = scmp.ne.s32.totalorder %s45_s11, %s62_s14  ;;  %p68_p2 = scmp.lt.s32.totalorder %s62_s14, %s62_s14 }
   0x6   :  { %58 = vset.pattern.permute.xlu0 %v86_v3  ;;  %60 = vset.pattern.permute.xlu1 %v87_v4 }
   0x7   :  { %21 = vperm.xlu0 %58, %v15_v0   ;;  %31 = vperm.xlu1 %60, %v15_v0   ;;  %p69_p3 = por %p68_p2, %p67_p1 }
   0x9   :  { %p70_p4 = pnand %p69_p3, %p63_p0 }
   0xb   :  { %61 = vset.pattern.permute.xlu0 %v87_v4 }
  0x7d   :  { %v18_v6 = vpop.permute.xlu0 %17  ;;  %v27_v7 = vpop.permute.xlu1 %26 }
  0x7e   :  { %vm19_vm0 = vcmp.eq.s32.totalorder %v14_v8, %v18_v6  ;;  %vm28_vm3 = vcmp.eq.s32.totalorder %v14_v8, %v27_v7 }
  0x82   :  { %v22_v9 = vpop.permute.xlu0 %21  ;;  %v32_v10 = vpop.permute.xlu1 %31 }
  0x83   :  { %vm23_vm1 = vcmp.eq.s32.totalorder %v14_v8, %v22_v9  ;;  %vm33_vm2 = vcmp.eq.s32.totalorder %v14_v8, %v32_v10 }
  0x84   :  { %vm24_vm4 = vmor %vm19_vm0, %vm23_vm1 }
  0x85   :  { %vm29_vm5 = vmor %vm24_vm4, %vm28_vm3 }
  0x86   :  { %vm34_vm6 = vmor %vm29_vm5, %vm33_vm2 }
  0x87   :  { %v35_v12 = vsel %vm34_vm6, %v12_v11, 0.0 }
  0x88   :  { %37 = vst [vmem:[#allocation2] sm:$0xff] %v35_v12 }
  0x89   :  { %73 = shalt.err (!%p70_p4)
}
  0x8a   :  { %47 = dma.vmem_to_hbm [thread:$0]  %s45_s11, 128, %s115_s2, [#allocation3]  }
  0x8b   :  { %82 = dma.done.wait [#allocation3], 128  }
  0x8c   :  { %83 = vsyncadd [#allocation3], 4294967168 }
  0x8d   :  { %51 = vsyncpa [#allocation3], 1 }

</bundles_post_ra>
